<compile_context>
chip_gen: v7x
topology: tpu7x:2x2x1
jax: 0.10.0
libtpu: 0.0.40
codegen_flags: <defaults>
</compile_context>

<pallas_src>
import jax
import jax.numpy as jnp
import numpy as np
from jax import lax
from jax.experimental import pallas as pl
from jax.experimental.pallas import tpu as pltpu


# ----------------------------- Pallas kernel ------------------------------- #
def conv1x1_softmax_kernel(x_ref, w_ref, b_ref, o_ref):
    """Fused pointwise conv (channel matmul) + bias + channel softmax.

    x_ref : [Cin,  MT]   activation tile (flattened voxels on the lane axis)
    w_ref : [Cout, Cin]  conv weight (resident)
    b_ref : [Cout, 1]    conv bias   (resident)
    o_ref : [Cout, MT]   softmax probabilities
    """
    # [Cout, Cin] @ [Cin, MT] -> [Cout, MT]  (f32 accumulation)
    logits = jnp.dot(w_ref[...], x_ref[...], preferred_element_type=jnp.float32)
    logits = logits + b_ref[...]

    # Numerically-stable softmax over the channel (sublane) axis.  Exact
    # division so probabilities sum to 1 to f32 precision.
    m = jnp.max(logits, axis=0, keepdims=True)
    e = jnp.exp(logits - m)
    s = jnp.sum(e, axis=0, keepdims=True)
    o_ref[...] = (e / s).astype(o_ref.dtype)


# ------------------------------- wrapper ------------------------------------ #
def _pick_m_tile(dhw: int, target: int = 8192) -> int:
    """Largest tile <= target that divides dhw (multiple of 128 when possible)."""
    if dhw <= target:
        return dhw
    best = dhw  # fall back to a single full slab if no nice divisor exists
    for t in range(128, target + 1, 128):
        if dhw % t == 0:
            best = t
    return best


def final_layer(x_ncdhw, w, b, *, m_tile_target=8192):
    """x_ncdhw: [N, Cin, D, H, W] f32 -> softmax probs [N, n_classes, D, H, W]."""
    N, Cin, D, H, W = x_ncdhw.shape
    Cout = w.shape[0]
    DHW = D * H * W

    # Free, contiguous reshape: no transpose, no pad, no extra HBM traffic.
    x3 = x_ncdhw.reshape(N, Cin, DHW)

    m_tile = _pick_m_tile(DHW, m_tile_target)
    nblk = DHW // m_tile  # exact by construction

    w2 = w.reshape(Cout, Cin).astype(jnp.float32)
    b2 = b.reshape(Cout, 1).astype(jnp.float32)

    out = pl.pallas_call(
        conv1x1_softmax_kernel,
        out_shape=jax.ShapeDtypeStruct((N, Cout, DHW), jnp.float32),
        grid=(N, nblk),
        in_specs=[
            # activation tile: leading batch dim squeezed, channels on sublanes
            pl.BlockSpec((None, Cin, m_tile), lambda n, i: (n, 0, i)),
            pl.BlockSpec((Cout, Cin), lambda n, i: (0, 0)),  # weight (resident)
            pl.BlockSpec((Cout, 1), lambda n, i: (0, 0)),    # bias   (resident)
        ],
        out_specs=pl.BlockSpec((None, Cout, m_tile), lambda n, i: (n, 0, i)),
        compiler_params=pltpu.CompilerParams(
            dimension_semantics=("parallel", "parallel"),
            vmem_limit_bytes=32 * 1024 * 1024,
        ),
    )(x3, w2, b2)

    return out.reshape(N, Cout, D, H, W)


# ------------------------------ pure-JAX ref -------------------------------- #
def reference(x, w, b):
    y = lax.conv_general_dilated(
        x, w, window_strides=(1, 1, 1), padding="VALID",
        dimension_numbers=("NCDHW", "OIDHW", "NCDHW"))
    y = y + b[None, :, None, None, None]
    return jax.nn.softmax(y, axis=1)


# ---------------------------------- main ------------------------------------ #
if __name__ == "__main__":
    n_features = 4    # input features
    n_classes = 3     # final classes
    N, D, H, W = 2, 16, 16, 16

    key = jax.random.PRNGKey(0)
    kx, kw, kb = jax.random.split(key, 3)

    x = jax.random.normal(kx, (N, n_features, D, H, W), jnp.float32)
    w = 0.1 * jax.random.normal(
        kw, (n_classes, n_features, 1, 1, 1), jnp.float32)
    b = 0.1 * jax.random.normal(kb, (n_classes,), jnp.float32)

    out = jax.block_until_ready(final_layer(x, w, b))
    ref = jax.block_until_ready(reference(x, w, b))

    assert out.shape == (N, n_classes, D, H, W), out.shape
    np.testing.assert_allclose(np.asarray(out), np.asarray(ref),
                               rtol=2e-3, atol=2e-3)
    # probabilities sum to 1 over the class dim
    np.testing.assert_allclose(np.asarray(out).sum(axis=1), 1.0,
                               rtol=1e-3, atol=1e-3)
    print("KERNEL_OK")
</pallas_src>

<mosaic_0001>
module attributes {stable_mosaic.version = 11 : i64} {
  func.func @conv1x1_softmax_kernel(%arg0: i32, %arg1: i32, %arg2: memref<1x4x4096xf32, #tpu.memory_space<vmem>>, %arg3: memref<3x4xf32, #tpu.memory_space<vmem>>, %arg4: memref<3x1xf32, #tpu.memory_space<vmem>>, %arg5: memref<1x3x4096xf32, #tpu.memory_space<vmem>>) attributes {dimension_semantics = [#tpu.dimension_semantics<parallel>, #tpu.dimension_semantics<parallel>], iteration_bounds = array<i64: 2, 1>, scalar_prefetch = 0 : i64, scratch_operands = 0 : i64, tpu.core_type = #tpu.core_type<tc>, window_params = [{transform_indices = @transform_0, window_bounds = array<i64: 1, 4, 4096>}, {pipeline_mode = #tpu.pipeline_mode<synchronous>, transform_indices = @transform_1, window_bounds = array<i64: 3, 4>}, {pipeline_mode = #tpu.pipeline_mode<synchronous>, transform_indices = @transform_2, window_bounds = array<i64: 3, 1>}, {transform_indices = @transform_3, window_bounds = array<i64: 1, 3, 4096>}]} {
    %c0 = arith.constant 0 : index
    %c0_0 = arith.constant 0 : index
    %0 = vector.load %arg3[%c0, %c0_0] : memref<3x4xf32, #tpu.memory_space<vmem>>, vector<3x4xf32>
    %c0_1 = arith.constant 0 : index
    %c0_2 = arith.constant 0 : index
    %c0_3 = arith.constant 0 : index
    %1 = vector.load %arg2[%c0_1, %c0_2, %c0_3] : memref<1x4x4096xf32, #tpu.memory_space<vmem>>, vector<1x4x4096xf32>
    %2 = vector.shape_cast %1 : vector<1x4x4096xf32> to vector<4x4096xf32>
    %cst = arith.constant dense<0.000000e+00> : vector<3x4096xf32>
    %3 = tpu.matmul %0, %2, %cst {dimension_numbers = #tpu.dot_dimension_numbers<[1], [0], [0], [1], [0, 0, 1, 1], [], []>} : vector<3x4xf32>, vector<4x4096xf32>, vector<3x4096xf32> -> vector<3x4096xf32>
    %c0_4 = arith.constant 0 : index
    %c0_5 = arith.constant 0 : index
    %4 = vector.load %arg4[%c0_4, %c0_5] : memref<3x1xf32, #tpu.memory_space<vmem>>, vector<3x1xf32>
    %5 = vector.broadcast %4 : vector<3x1xf32> to vector<3x4096xf32>
    %6 = arith.addf %3, %5 : vector<3x4096xf32>
    %cst_6 = arith.constant dense<0xFF800000> : vector<4096xf32>
    %7 = vector.multi_reduction <maximumf>, %6, %cst_6 [0] : vector<3x4096xf32> to vector<4096xf32>
    %8 = vector.shape_cast %7 : vector<4096xf32> to vector<1x4096xf32>
    %9 = vector.broadcast %8 : vector<1x4096xf32> to vector<3x4096xf32>
    %10 = arith.subf %6, %9 : vector<3x4096xf32>
    %11 = math.exp %10 : vector<3x4096xf32>
    %cst_7 = arith.constant dense<0.000000e+00> : vector<4096xf32>
    %12 = vector.multi_reduction <add>, %11, %cst_7 [0] : vector<3x4096xf32> to vector<4096xf32>
    %13 = vector.shape_cast %12 : vector<4096xf32> to vector<1x4096xf32>
    %14 = vector.broadcast %13 : vector<1x4096xf32> to vector<3x4096xf32>
    %15 = arith.divf %11, %14 : vector<3x4096xf32>
    %c0_8 = arith.constant 0 : index
    %c0_9 = arith.constant 0 : index
    %c0_10 = arith.constant 0 : index
    %16 = vector.load %arg5[%c0_8, %c0_9, %c0_10] : memref<1x3x4096xf32, #tpu.memory_space<vmem>>, vector<1x3x4096xf32>
    %17 = vector.shape_cast %16 : vector<1x3x4096xf32> to vector<3x4096xf32>
    %18 = vector.shape_cast %15 : vector<3x4096xf32> to vector<1x3x4096xf32>
    tpu.vector_store %arg5[%c0_8, %c0_9, %c0_10], %18 {strides = array<i32>} : memref<1x3x4096xf32, #tpu.memory_space<vmem>>, vector<1x3x4096xf32>,
    return
  }
  func.func @transform_0(%arg0: i32, %arg1: i32) -> (i32, i32, i32) {
    %c0_i32 = arith.constant 0 : i32
    %c0_i32_0 = arith.constant 0 : i32
    return %arg0, %c0_i32, %arg1 : i32, i32, i32
  }
  func.func @transform_1(%arg0: i32, %arg1: i32) -> (i32, i32) {
    %c0_i32 = arith.constant 0 : i32
    %c0_i32_0 = arith.constant 0 : i32
    %c0_i32_1 = arith.constant 0 : i32
    return %c0_i32, %c0_i32_0 : i32, i32
  }
  func.func @transform_2(%arg0: i32, %arg1: i32) -> (i32, i32) {
    %c0_i32 = arith.constant 0 : i32
    %c0_i32_0 = arith.constant 0 : i32
    %c0_i32_1 = arith.constant 0 : i32
    return %c0_i32, %c0_i32_0 : i32, i32
  }
  func.func @transform_3(%arg0: i32, %arg1: i32) -> (i32, i32, i32) {
    %c0_i32 = arith.constant 0 : i32
    %c0_i32_0 = arith.constant 0 : i32
    return %arg0, %c0_i32, %arg1 : i32, i32, i32
  }
}

</mosaic_0001>

<bundles_post_ra>
// kernel: tpu_custom_call.1
= control target key start
LH: loop header
LB: loop body
LE: loop exit
PB: predicated region body
PF: predicated region fallthrough
CT: control target
= control target key end

     0   :  { %8 = vsyncpa [#allocation3], 0  ;;  %s3320_s0 = inlined_call_operand.hbm [shape: f32[2,4,4096], index: 0, kind: input, shape index: {}]   ;;  %s3321_s1 = inlined_call_operand.vmem [shape: f32[3,4], index: 1, kind: input, shape index: {}]   ;;  %s3322_s2 = inlined_call_operand.vmem [shape: f32[3,1], index: 2, kind: input, shape index: {}]   ;;  %s3323_s3 = inlined_call_operand.vmem [shape: f32[2,3,4096], index: 3, kind: output, shape index: {}]  }
   0x1   :  { %10 = vsyncpa [#allocation3 + $0x1], 0  ;;  %s2631_s12 = smov 0   ;;  %s2633_s13 = smov 0  }
   0x2   :  { %s2635_s14 = smov 0   ;;  %s2637_s15 = smov 0  }
   0x3   :  { %s2639_s16 = smov 0   ;;  %s2641_s17 = smov 0  }
   0x4 LB: > { %s2261_s18 = sadd.s32 4294967295, %s2606_s17   ;;  %s28_s19 = sadd.s32 1, %s2602_s16  ;;  %s2606_s17 = sphi %s2641_s17, %s16_s17   ;;  %s2602_s16 = sphi %s2639_s16, %s3344_s16   ;;  %s2598_s15 = sphi %s2637_s15, %s3343_s15   ;;  %s2594_s14 = sphi %s2635_s14, %s3342_s14   ;;  %s2590_s13 = sphi %s2633_s13, %s3341_s13   ;;  %s2586_s12 = sphi %s2631_s12, %s3340_s12  }
   0x5   : > { %p30_p0 = scmp.ge.s32.totalorder %s28_s19, 2  ;;  %s37_s20 = sadd.s32 1, %s2594_s14 }
   0x6   : > { %p44_p1 = scmp.ne.s32.totalorder %s2594_s14, %s2590_s13  ;;  %p45_p2 = scmp.eq.s32.totalorder %s2606_s17, 0 }
   0x7   : > { %s3346_s19 = smov (%p30_p0, %s28_s19), 0  ;;  %p50_p4 = scmp.ne.s32.totalorder %s2590_s13, %s2586_s12 }
   0x8   : > { %p2667_p3 = por %p45_p2, %p44_p1  ;;  %s32_s22 = ssub.s32 %s2602_s16, %s3346_s19 }
   0x9   : > { %p51_p5 = scmp.eq.s32.totalorder %s2261_s18, 0  ;;  %p35_p6 = scmp.eq.s32.totalorder %s32_s22, 0 }
   0xa   : > { %p2330_p8 = scmp.lt.s32.totalorder %s2606_s17, 2  ;;  %s150_s25 = sand.u32 1, %s2594_s14  }
   0xb   : > { %p2674_p7 = por %p51_p5, %p50_p4  ;;  %s2322_s26 = sshll.u32 %s2602_s16, 11 }
   0xc   : > { %s2680_s24 = scalar_select %p35_p6, %s2594_s14, %s37_s20  }
   0xd   : > { %s2265_s27 = sshll.u32 %s150_s25, 7  ;;  %s2687_s30 = scalar_lea.hbm %s3320_s0, %s2322_s26 }
   0xe   : > { %s154_s4 = scalar_lea.vmem [#allocation2], %s2265_s27  ;;  %p2691_p9 = pnand %p2330_p8, %p2667_p3 }
   0xf   : > { %s164_s5 = sshll.u32 %s154_s4, 4  ;;  %s151_s7 = scalar_lea.sflag [#allocation3], %s150_s25  ;;  %s2695_s5 = int_to_ptr.vmem [resolvable:$true] %s164_s5 }
  0x10   : > { %s2526_s8 = scalar_lea.hbm %s2687_s30, 2048  ;;  %p2528_p13 = pneg %p2691_p9 }
  0x11   : > { %p2527_p12 = scmp.ne.s32.totalorder %s2687_s30, %s2526_s8  ;;  %s2531_s11 = scalar_lea.hbm %s3320_s0, 4096 }
  0x12   : > { %p2532_p2 = scmp.lt.u32.totalorder %s2687_s30, %s3320_s0  ;;  %p2533_p3 = scmp.lt.u32.totalorder %s2531_s11, %s2526_s8 }
  0x13   : > { %p2529_p0 = pnand %p2528_p13, %p2527_p12  ;;  %p2535_p5 = scmp.lt.u32.totalorder %s2526_s8, %s2687_s30 }
  0x14   : > { %p2534_p4 = por %p2533_p3, %p2532_p2 }
  0x15   : > { %p2530_p1 = pneg %p2529_p0 }
  0x16   : > { %p2536_p6 = por %p2535_p5, %p2534_p4 }
  0x18   : > { %p2537_p8 = pnand %p2536_p6, %p2530_p1 }
  0x1a   : > { %2540 = shalt.err (!%p2537_p8)
}
  0x1b   : > { %s2541_s20 = scalar_lea.vmem %s2695_s5, 2048  ;;  %s2608_s21 = smov [#allocation2]  }
  0x1c   : > { %p2542_p12 = scmp.ne.s32.totalorder %s2695_s5, %s2541_s20  ;;  %s2546_s22 = sshll.u32 %s2608_s21, 4  ;;  %s2547_s22 = int_to_ptr.vmem [resolvable:$false] %s2546_s22 }
  0x1d   : > { %s2548_s25 = scalar_lea.vmem %s2547_s22, 4096  ;;  %p2549_p11 = scmp.lt.s32.totalorder %s2695_s5, %s2547_s22 }
  0x1e   : > { %p2544_p0 = pnand %p2542_p12, %p2528_p13  ;;  %p2550_p2 = scmp.lt.s32.totalorder %s2548_s25, %s2541_s20 }
  0x20   : > { %p2545_p10 = pneg %p2544_p0  ;;  %p2551_p3 = por %p2550_p2, %p2549_p11 }
  0x22   : > { %p2552_p4 = pnand %p2551_p3, %p2545_p10 }
  0x24   : > { %2555 = shalt.err (!%p2552_p4)
}
  0x25   : > { %2329 = dma.hbm_to_vmem [thread:$0]  (!%p2691_p9), %s2687_s30, 2048, %s2695_s5, %s151_s7  }
  0x26   : > { %p3327_p1 = scmp.lt.s32.totalorder %s2606_s17, 3  ;;  %p3328_p5 = scmp.ge.s32.totalorder %s2606_s17, 1 }
  0x28   : > { %p170_p13 = pnand %p3328_p5, %p3327_p1 }
  0x2a   : > { %173 = sbr.rel (%p170_p13) target bundleno = 469 (0x1d5), region = 32 }
  0x31   : > { %s175_s26 = sand.u32 1, %s2590_s13  }
  0x32   : > { %s2269_s27 = sshll.u32 %s175_s26, 7  ;;  %s176_s28 = scalar_lea.sflag [#allocation3], %s175_s26 }
  0x33   : > { %s2729_s29 = scalar_lea.vmem [#allocation2], %s2269_s27 }
  0x34   : > { %2581 = dma.done.wait (%p2674_p7), %s176_s28, 2048  }
  0x35   : > { %2583 = vsyncadd (%p2674_p7), %s176_s28, 4294965248  ;;  %v2609_v0 = vmov 0.0   ;;  %v2610_v1 = vmov 0   ;;  %v218_v2 = vld [vmem:[%s2729_s29] sm:$0xff]  ;;  %vm276_vm0 = vcmask 1043456   ;;  %v219_v3 = vld [vmem:[%s2729_s29 + $0x8] sm:$0xff] }
  0x36   : > { %405 = vmatprep.mubr.f32.mxu0 %v2609_v0  ;;  %476 = vmatprep.mubr.f32.mxu1 %v2609_v0  ;;  %v256_v4 = vcombine.high %v218_v2, %v218_v2  ;;  %v257_v5 = vcombine.high %v219_v3, %v219_v3  ;;  %v220_v6 = vld [vmem:[%s2729_s29 + $0x10] sm:$0xff]  ;;  %v221_v7 = vld [vmem:[%s2729_s29 + $0x18] sm:$0xff]  ;;  %v2744_v8 = vld [vmem:[%s3321_s1] sm:$0x7]  ;;  %vm272_vm1 = vcmask 31744   ;;  %vm1477_vm2 = vcmask 1042432  }
  0x37   : > { %2381 = vset.pattern.permute.xlu0 %v2610_v1  ;;  %v258_v9 = vcombine.high %v220_v6, %v220_v6  ;;  %v259_v10 = vcombine.high %v221_v7, %v221_v7  ;;  %v222_v11 = vld [vmem:[%s2729_s29 + $0x20] sm:$0xff]  ;;  %v223_v12 = vld [vmem:[%s2729_s29 + $0x28] sm:$0xff]  ;;  %v224_v15 = vld [vmem:[%s2729_s29 + $0x30] sm:$0xff]  ;;  %p208_p7 = scmp.lt.s32.totalorder %s2598_s15, 1 }
  0x38   : > { %2272 = vmatprep.subr.msk.mxu0 %vm276_vm0, %v256_v4  ;;  %2275 = vmatprep.subr.msk.mxu1 %vm276_vm0, %v257_v5  ;;  %v260_v13 = vcombine.high %v222_v11, %v222_v11  ;;  %v261_v14 = vcombine.high %v223_v12, %v223_v12  ;;  %v225_v16 = vld [vmem:[%s2729_s29 + $0x38] sm:$0xff]  ;;  %v262_v17 = vcombine.high %v224_v15, %v224_v15  ;;  %v226_v19 = vld [vmem:[%s2729_s29 + $0x40] sm:$0xff]  ;;  %v227_v20 = vld [vmem:[%s2729_s29 + $0x48] sm:$0xff] }
  0x39   : > { %2273 = vmatpush1.msk.msra.mxu0 %vm276_vm0, %v218_v2  ;;  %2276 = vmatpush1.msk.msra.mxu1 %vm276_vm0, %v219_v3  ;;  %v263_v18 = vcombine.high %v225_v16, %v225_v16  ;;  %v264_v21 = vcombine.high %v226_v19, %v226_v19  ;;  %v265_v22 = vcombine.high %v227_v20, %v227_v20  ;;  %v228_v23 = vld [vmem:[%s2729_s29 + $0x50] sm:$0xff]  ;;  %v229_v24 = vld [vmem:[%s2729_s29 + $0x58] sm:$0xff]  ;;  %v230_v27 = vld [vmem:[%s2729_s29 + $0x60] sm:$0xff]  ;;  %s3348_s15 = smov (!%p208_p7, %s2598_s15), 1 }
  0x3a   : > { %2274 = vmatmul.mubr.msk.f32.vlgmr.msra.gmra.mrb[0].mxu0 %vm272_vm1, %v2744_v8  ;;  %2277 = vmatmul.mubr.msk.f32.vlgmr.msra.gmra.mrb[0].mxu1 %vm272_vm1, %v2744_v8  ;;  %v266_v25 = vcombine.high %v228_v23, %v228_v23  ;;  %v267_v26 = vcombine.high %v229_v24, %v229_v24  ;;  %v231_v28 = vld [vmem:[%s2729_s29 + $0x68] sm:$0xff]  ;;  %v268_v29 = vcombine.high %v230_v27, %v230_v27  ;;  %v232_v31 = vld [vmem:[%s2729_s29 + $0x70] sm:$0xff]  ;;  %v233_v32 = vld [vmem:[%s2729_s29 + $0x78] sm:$0xff]  ;;  %s2323_s6 = sshll.u32 %s3348_s15, 7 }
  0x3b   : > { %2278 = vmatprep.subr.msk.mxu0 %vm276_vm0, %v258_v9  ;;  %2281 = vmatprep.subr.msk.mxu1 %vm276_vm0, %v259_v10  ;;  %v269_v30 = vcombine.high %v231_v28, %v231_v28  ;;  %v270_v33 = vcombine.high %v232_v31, %v232_v31  ;;  %v271_v34 = vcombine.high %v233_v32, %v233_v32  ;;  %v234_v35 = vld [vmem:[%s3322_s2] sm:$0x7]  ;;  %s3056_s8 = scalar_lea.vmem %s3323_s3, %s2323_s6 }
  0x3c   : > { %2279 = vmatpush1.msk.msra.mxu0 %vm276_vm0, %v220_v6  ;;  %2282 = vmatpush1.msk.msra.mxu1 %vm276_vm0, %v221_v7 }
  0x3d   : > { %547 = vmatprep.mubr.f32.mxu0 %v2609_v0  ;;  %618 = vmatprep.mubr.f32.mxu1 %v2609_v0 }
  0x3e   : > { %2280 = vmatmul.mubr.msk.f32.vlgmr.msra.gmra.mrb[2].mxu0 %vm272_vm1, %v2744_v8  ;;  %2283 = vmatmul.mubr.msk.f32.vlgmr.msra.gmra.mrb[2].mxu1 %vm272_vm1, %v2744_v8 }
  0x3f   : > { %2284 = vmatprep.subr.msk.mxu0 %vm276_vm0, %v260_v13  ;;  %2287 = vmatprep.subr.msk.mxu1 %vm276_vm0, %v261_v14 }
  0x40   : > { %2285 = vmatpush1.msk.msra.mxu0 %vm276_vm0, %v222_v11  ;;  %2288 = vmatpush1.msk.msra.mxu1 %vm276_vm0, %v223_v12 }
  0x41   : > { %689 = vmatprep.mubr.f32.mxu0 %v2609_v0  ;;  %760 = vmatprep.mubr.f32.mxu1 %v2609_v0 }
  0x42   : > { %2286 = vmatmul.mubr.msk.f32.vlgmr.msra.gmra.mrb[4].mxu0 %vm272_vm1, %v2744_v8  ;;  %2289 = vmatmul.mubr.msk.f32.vlgmr.msra.gmra.mrb[4].mxu1 %vm272_vm1, %v2744_v8 }
  0x43   : > { %2290 = vmatprep.subr.msk.mxu0 %vm276_vm0, %v262_v17  ;;  %2293 = vmatprep.subr.msk.mxu1 %vm276_vm0, %v263_v18 }
  0x44   : > { %2291 = vmatpush1.msk.msra.mxu0 %vm276_vm0, %v224_v15  ;;  %2294 = vmatpush1.msk.msra.mxu1 %vm276_vm0, %v225_v16 }
  0x45   : > { %831 = vmatprep.mubr.f32.mxu0 %v2609_v0  ;;  %902 = vmatprep.mubr.f32.mxu1 %v2609_v0 }
  0x46   : > { %2292 = vmatmul.mubr.msk.f32.vlgmr.msra.gmra.mrb[6].mxu0 %vm272_vm1, %v2744_v8  ;;  %2295 = vmatmul.mubr.msk.f32.vlgmr.msra.gmra.mrb[6].mxu1 %vm272_vm1, %v2744_v8 }
  0x47   : > { %2296 = vmatprep.subr.msk.mxu0 %vm276_vm0, %v264_v21  ;;  %2299 = vmatprep.subr.msk.mxu1 %vm276_vm0, %v265_v22 }
  0x48   : > { %2297 = vmatpush1.msk.msra.mxu0 %vm276_vm0, %v226_v19  ;;  %2300 = vmatpush1.msk.msra.mxu1 %vm276_vm0, %v227_v20 }
  0x49   : > { %973 = vmatprep.mubr.f32.mxu0 %v2609_v0  ;;  %1044 = vmatprep.mubr.f32.mxu1 %v2609_v0 }
  0x4a   : > { %2298 = vmatmul.mubr.msk.f32.vlgmr.msra.gmra.mrb[8].mxu0 %vm272_vm1, %v2744_v8  ;;  %2301 = vmatmul.mubr.msk.f32.vlgmr.msra.gmra.mrb[8].mxu1 %vm272_vm1, %v2744_v8 }
  0x4b   : > { %2302 = vmatprep.subr.msk.mxu0 %vm276_vm0, %v266_v25  ;;  %2305 = vmatprep.subr.msk.mxu1 %vm276_vm0, %v267_v26 }
  0x4c   : > { %2303 = vmatpush1.msk.msra.mxu0 %vm276_vm0, %v228_v23  ;;  %2306 = vmatpush1.msk.msra.mxu1 %vm276_vm0, %v229_v24 }
  0x4d   : > { %1115 = vmatprep.mubr.f32.mxu0 %v2609_v0  ;;  %1186 = vmatprep.mubr.f32.mxu1 %v2609_v0 }
  0x4e   : > { %2304 = vmatmul.mubr.msk.f32.vlgmr.msra.gmra.mrb[10].mxu0 %vm272_vm1, %v2744_v8  ;;  %2307 = vmatmul.mubr.msk.f32.vlgmr.msra.gmra.mrb[10].mxu1 %vm272_vm1, %v2744_v8 }
  0x4f   : > { %2308 = vmatprep.subr.msk.mxu0 %vm276_vm0, %v268_v29  ;;  %2311 = vmatprep.subr.msk.mxu1 %vm276_vm0, %v269_v30 }
  0x50   : > { %2309 = vmatpush1.msk.msra.mxu0 %vm276_vm0, %v230_v27  ;;  %2312 = vmatpush1.msk.msra.mxu1 %vm276_vm0, %v231_v28 }
  0x51   : > { %1257 = vmatprep.mubr.f32.mxu0 %v2609_v0  ;;  %1328 = vmatprep.mubr.f32.mxu1 %v2609_v0 }
  0x52   : > { %2310 = vmatmul.mubr.msk.f32.vlgmr.msra.gmra.mrb[12].mxu0 %vm272_vm1, %v2744_v8  ;;  %2313 = vmatmul.mubr.msk.f32.vlgmr.msra.gmra.mrb[12].mxu1 %vm272_vm1, %v2744_v8 }
  0x53   : > { %2314 = vmatprep.subr.msk.mxu0 %vm276_vm0, %v270_v33  ;;  %2317 = vmatprep.subr.msk.mxu1 %vm276_vm0, %v271_v34 }
  0x54   : > { %2315 = vmatpush1.msk.msra.mxu0 %vm276_vm0, %v232_v31  ;;  %2318 = vmatpush1.msk.msra.mxu1 %vm276_vm0, %v233_v32 }
  0x55   : > { %1399 = vmatprep.mubr.f32.mxu0 %v2609_v0  ;;  %1470 = vmatprep.mubr.f32.mxu1 %v2609_v0 }
  0x56   : > { %2316 = vmatmul.mubr.msk.f32.vlgmr.msra.gmra.mrb[14].mxu0 %vm272_vm1, %v2744_v8  ;;  %2319 = vmatmul.mubr.msk.f32.vlgmr.msra.gmra.mrb[14].mxu1 %vm272_vm1, %v2744_v8 }
  0x57   : > { %237 = vperm.xlu0 %2381, %v234_v35  }
  0xd6   : > { %v2839_v36 = vpop.permute.xlu0 %237 }
 0x10d   : > { %v407_v37 = vpop.f32.mrb[0].mxu0  ;;  %v478_v38 = vpop.f32.mrb[0].mxu1 }
 0x10e   : > { %v2842_v39 = vadd.f32 %v407_v37, %v2839_v36  ;;  %v2845_v40 = vadd.f32 %v478_v38, %v2839_v36  ;;  %v409_v41 = vpop.f32.mrb[1].mxu0  ;;  %v480_v42 = vpop.f32.mrb[1].mxu1 }
 0x10f   : > { %v2848_v43 = vadd.f32 %v409_v41, %v2839_v36  ;;  %v2851_v44 = vadd.f32 %v480_v42, %v2839_v36 }
 0x110   : > { %v1478_v45 = vsel %vm1477_vm2, %v2842_v39, -inf  ;;  %v1492_v46 = vsel %vm1477_vm2, %v2845_v40, -inf }
 0x111   : > { %v1479_v47 = vrot.slane %v1478_v45, 4  ;;  %v1493_v48 = vrot.slane %v1492_v46, 4  ;;  %v1485_v49 = vsel %vm1477_vm2, %v2848_v43, -inf  ;;  %v1499_v50 = vsel %vm1477_vm2, %v2851_v44, -inf  ;;  %v549_v51 = vpop.f32.mrb[2].mxu0  ;;  %v620_v52 = vpop.f32.mrb[2].mxu1 }
 0x112   : > { %v1486_v53 = vrot.slane %v1485_v49, 4  ;;  %v1500_v54 = vrot.slane %v1499_v50, 4  ;;  %v2862_v55 = vadd.f32 %v549_v51, %v2839_v36  ;;  %v2865_v56 = vadd.f32 %v620_v52, %v2839_v36  ;;  %v551_v57 = vpop.f32.mrb[3].mxu0  ;;  %v622_v58 = vpop.f32.mrb[3].mxu1 }
 0x113   : > { %v1480_v59 = vmax.f32 %v1478_v45, %v1479_v47  ;;  %v1494_v60 = vmax.f32 %v1492_v46, %v1493_v48  ;;  %v2868_v61 = vadd.f32 %v551_v57, %v2839_v36  ;;  %v2871_v62 = vadd.f32 %v622_v58, %v2839_v36 }
 0x114   : > { %v1487_v63 = vmax.f32 %v1485_v49, %v1486_v53  ;;  %v1501_v0 = vmax.f32 %v1499_v50, %v1500_v54  ;;  %v1506_v1 = vsel %vm1477_vm2, %v2862_v55, -inf  ;;  %v1520_v2 = vsel %vm1477_vm2, %v2865_v56, -inf }
 0x115   : > { %v1481_v3 = vrot.slane %v1480_v59, 2  ;;  %v1495_v4 = vrot.slane %v1494_v60, 2  ;;  %v1507_v5 = vrot.slane %v1506_v1, 4  ;;  %v1521_v6 = vrot.slane %v1520_v2, 4  ;;  %v691_v7 = vpop.f32.mrb[4].mxu0  ;;  %v2877_v8 = vpop.f32.mrb[4].mxu1 }
 0x116   : > { %v1488_v9 = vrot.slane %v1487_v63, 2  ;;  %v1502_v10 = vrot.slane %v1501_v0, 2  ;;  %v1513_v11 = vsel %vm1477_vm2, %v2868_v61, -inf  ;;  %v1527_v12 = vsel %vm1477_vm2, %v2871_v62, -inf  ;;  %v2883_v13 = vpop.f32.mrb[5].mxu0  ;;  %v2885_v14 = vpop.f32.mrb[5].mxu1 }
 0x117   : > { %v1482_v15 = vmax.f32 %v1480_v59, %v1481_v3  ;;  %v1496_v16 = vmax.f32 %v1494_v60, %v1495_v4  ;;  %v1508_v17 = vmax.f32 %v1506_v1, %v1507_v5  ;;  %v1522_v18 = vmax.f32 %v1520_v2, %v1521_v6 }
 0x118   : > { %v1489_v19 = vmax.f32 %v1487_v63, %v1488_v9  ;;  %v1503_v20 = vmax.f32 %v1501_v0, %v1502_v10  ;;  %v1514_v21 = vrot.slane %v1513_v11, 4  ;;  %v1528_v22 = vrot.slane %v1527_v12, 4 }
 0x119   : > { %v1483_v23 = vrot.slane %v1482_v15, 1  ;;  %v1497_v24 = vrot.slane %v1496_v16, 1  ;;  %v1509_v25 = vrot.slane %v1508_v17, 2  ;;  %v1523_v26 = vrot.slane %v1522_v18, 2  ;;  %v2887_v27 = vpop.f32.mrb[6].mxu0  ;;  %v2889_v28 = vpop.f32.mrb[6].mxu1 }
 0x11a   : > { %v1490_v29 = vrot.slane %v1489_v19, 1  ;;  %v1504_v30 = vrot.slane %v1503_v20, 1  ;;  %v1515_v31 = vmax.f32 %v1513_v11, %v1514_v21  ;;  %v1529_v32 = vmax.f32 %v1527_v12, %v1528_v22  ;;  %v2891_v33 = vpop.f32.mrb[7].mxu0  ;;  %v2893_v34 = vpop.f32.mrb[7].mxu1 }
 0x11b   : > { %v1484_v35 = vmax.f32 %v1482_v15, %v1483_v23  ;;  %v1498_v37 = vmax.f32 %v1496_v16, %v1497_v24  ;;  %v1510_v38 = vmax.f32 %v1508_v17, %v1509_v25  ;;  %v1524_v41 = vmax.f32 %v1522_v18, %v1523_v26 }
 0x11c   : > { %v1491_v42 = vmax.f32 %v1489_v19, %v1490_v29  ;;  %v1505_v45 = vmax.f32 %v1503_v20, %v1504_v30  ;;  %v1516_v46 = vrot.slane %v1515_v31, 2  ;;  %v1530_v47 = vrot.slane %v1529_v32, 2 }
 0x11d   : > { %v1702_v48 = vsub.f32 %v2842_v39, %v1484_v35  ;;  %v1704_v49 = vsub.f32 %v2845_v40, %v1498_v37  ;;  %v1511_v50 = vrot.slane %v1510_v38, 1  ;;  %v1525_v51 = vrot.slane %v1524_v41, 1  ;;  %v2897_v52 = vpop.f32.mrb[8].mxu0  ;;  %v2899_v53 = vpop.f32.mrb[8].mxu1 }
 0x11e   : > { %v1703_v54 = vsub.f32 %v2848_v43, %v1491_v42  ;;  %v1705_v57 = vsub.f32 %v2851_v44, %v1505_v45  ;;  %v1517_v58 = vmax.f32 %v1515_v31, %v1516_v46  ;;  %v1531_v59 = vmax.f32 %v1529_v32, %v1530_v47  ;;  %v2903_v60 = vpop.f32.mrb[9].mxu0  ;;  %v2905_v63 = vpop.f32.mrb[9].mxu1 }
 0x11f   : > { %v1734_v0 = vmul.f32 1.442695, %v1702_v48  ;;  %v1738_v39 = vmul.f32 1.442695, %v1704_v49  ;;  %v1512_v1 = vmax.f32 %v1510_v38, %v1511_v50  ;;  %v1526_v40 = vmax.f32 %v1524_v41, %v1525_v51 }
 0x120   : > { %v1736_v2 = vmul.f32 1.442695, %v1703_v54  ;;  %v1740_v3 = vmul.f32 1.442695, %v1705_v57  ;;  %v1518_v4 = vrot.slane %v1517_v58, 1  ;;  %v1532_v5 = vrot.slane %v1531_v59, 1 }
 0x121   : > { %2398 = vpow2.f32 %v1734_v0  ;;  %v1706_v6 = vsub.f32 %v2862_v55, %v1512_v1  ;;  %v1708_v43 = vsub.f32 %v2865_v56, %v1526_v40  ;;  %v2910_v44 = vadd.f32 %v691_v7, %v2839_v36  ;;  %v2912_v9 = vpop.f32.mrb[10].mxu0  ;;  %v2914_v10 = vpop.f32.mrb[10].mxu1 }
 0x122   : > { %2400 = vpow2.f32 %v1738_v39  ;;  %v1519_v11 = vmax.f32 %v1517_v58, %v1518_v4  ;;  %v1533_v12 = vmax.f32 %v1531_v59, %v1532_v5  ;;  %v2918_v15 = vadd.f32 %v2877_v8, %v2839_v36  ;;  %v2920_v16 = vpop.f32.mrb[11].mxu0  ;;  %v2922_v17 = vpop.f32.mrb[11].mxu1 }
 0x123   : > { %2402 = vpow2.f32 %v1736_v2  ;;  %v1742_v55 = vmul.f32 1.442695, %v1706_v6  ;;  %v1746_v56 = vmul.f32 1.442695, %v1708_v43  ;;  %v1534_v7 = vsel %vm1477_vm2, %v2910_v44, -inf }
 0x124   : > { %2404 = vpow2.f32 %v1740_v3  ;;  %v1707_v18 = vsub.f32 %v2868_v61, %v1519_v11  ;;  %v1709_v19 = vsub.f32 %v2871_v62, %v1533_v12  ;;  %v1535_v20 = vrot.slane %v1534_v7, 4 }
 0x125   : > { %2406 = vpow2.f32 %v1742_v55  ;;  %v1548_v8 = vsel %vm1477_vm2, %v2918_v15, -inf  ;;  %v2932_v21 = vadd.f32 %v2883_v13, %v2839_v36  ;;  %v2936_v22 = vadd.f32 %v2885_v14, %v2839_v36  ;;  %v2938_v23 = vpop.f32.mrb[12].mxu0  ;;  %v2940_v24 = vpop.f32.mrb[12].mxu1 }
 0x126   : > { %2408 = vpow2.f32 %v1746_v56  ;;  %v1744_v61 = vmul.f32 1.442695, %v1707_v18  ;;  %v1748_v62 = vmul.f32 1.442695, %v1709_v19  ;;  %v1536_v25 = vmax.f32 %v1534_v7, %v1535_v20  ;;  %v2942_v26 = vpop.f32.mrb[13].mxu0  ;;  %v2944_v29 = vpop.f32.mrb[13].mxu1 }
 0x127   : > { %3329 = vst [vmem:[#allocation5_spill] sm:$0xff] %v2944_v29  ;;  %v1549_v30 = vrot.slane %v1548_v8, 4  ;;  %v1541_v13 = vsel %vm1477_vm2, %v2932_v21, -inf  ;;  %v1555_v14 = vsel %vm1477_vm2, %v2936_v22, -inf  ;;  %v2952_v31 = vadd.f32 %v2887_v27, %v2839_v36 }
 0x128   : > { %2410 = vpow2.f32 %v1744_v61  ;;  %v1537_v32 = vrot.slane %v1536_v25, 2  ;;  %v1542_v35 = vrot.slane %v1541_v13, 4  ;;  %v1556_v37 = vrot.slane %v1555_v14, 4 }
 0x129   : > { %2412 = vpow2.f32 %v1748_v62  ;;  %v1550_v38 = vmax.f32 %v1548_v8, %v1549_v30  ;;  %v1562_v41 = vsel %vm1477_vm2, %v2952_v31, -inf  ;;  %v2958_v42 = vadd.f32 %v2889_v28, %v2839_v36  ;;  %v2960_v45 = vpop.f32.mrb[14].mxu0  ;;  %v2962_v46 = vpop.f32.mrb[14].mxu1 }
 0x12a   : > { %3330 = vst [vmem:[#allocation6_spill] sm:$0xff] %v2960_v45  ;;  %3331 = vst [vmem:[#allocation7_spill] sm:$0xff] %v2962_v46  ;;  %v1538_v47 = vmax.f32 %v1536_v25, %v1537_v32  ;;  %v1543_v27 = vmax.f32 %v1541_v13, %v1542_v35  ;;  %v2964_v48 = vmax.f32 %v1555_v14, %v1556_v37  ;;  %v1563_v49 = vrot.slane %v1562_v41, 4  ;;  %v2966_v50 = vpop.f32.mrb[15].mxu0  ;;  %v2968_v51 = vpop.f32.mrb[15].mxu1 }
 0x12b   : > { %3332 = vst [vmem:[#allocation8_spill] sm:$0xff] %v2966_v50  ;;  %3333 = vst [vmem:[#allocation9_spill] sm:$0xff] %v2968_v51  ;;  %v2970_v54 = vpop.eup %2398  ;;  %v1551_v57 = vrot.slane %v1550_v38, 2  ;;  %v2974_v28 = vsel %vm1477_vm2, %v2958_v42, -inf  ;;  %v2978_v58 = vadd.f32 %v2891_v33, %v2839_v36  ;;  %v2982_v59 = vadd.f32 %v2893_v34, %v2839_v36 }
 0x12c   : > { %v2984_v0 = vpop.eup %2400  ;;  %v1798_v39 = vsel %vm1477_vm2, %v2970_v54, 0.0  ;;  %v1539_v1 = vrot.slane %v1538_v47, 1  ;;  %v1544_v40 = vrot.slane %v1543_v27, 2  ;;  %v2993_v6 = vmax.f32 %v1562_v41, %v1563_v49 }
 0x12d   : > { %v2989_v3 = vpop.eup %2402  ;;  %v1799_v4 = vrot.slane %v1798_v39, 4  ;;  %v1812_v33 = vsel %vm1477_vm2, %v2984_v0, 0.0  ;;  %v1552_v5 = vmax.f32 %v1550_v38, %v1551_v57 }
 0x12e   : > { %v2995_v34 = vpop.eup %2404  ;;  %v1813_v43 = vrot.slane %v1812_v33, 4  ;;  %v1805_v11 = vsel %vm1477_vm2, %v2989_v3, 0.0  ;;  %v1540_v12 = vmax.f32 %v1538_v47, %v1539_v1  ;;  %v2999_v55 = vmax.f32 %v1543_v27, %v1544_v40 }
 0x12f   : > { %v3001_v56 = vpop.eup %2406  ;;  %v1800_v7 = vadd.f32 %v1799_v4, %v1798_v39  ;;  %v1806_v18 = vrot.slane %v1805_v11, 4  ;;  %v1819_v19 = vsel %vm1477_vm2, %v2995_v34, 0.0  ;;  %v1553_v20 = vrot.slane %v1552_v5, 1 }
 0x130   : > { %v3005_v8 = vpop.eup %2408  ;;  %v1814_v61 = vadd.f32 %v1813_v43, %v1812_v33  ;;  %v1820_v62 = vrot.slane %v1819_v19, 4  ;;  %v1826_v25 = vsel %vm1477_vm2, %v3001_v56, 0.0  ;;  %v1710_v30 = vsub.f32 %v2910_v44, %v1540_v12 }
 0x131   : > { %v1801_v13 = vrot.slane %v1800_v7, 2  ;;  %v1807_v14 = vadd.f32 %v1806_v18, %v1805_v11  ;;  %v1827_v32 = vrot.slane %v1826_v25, 4  ;;  %v1840_v35 = vsel %vm1477_vm2, %v3005_v8, 0.0 }
 0x132   : > { %v3012_v37 = vpop.eup %2410  ;;  %v1815_v38 = vrot.slane %v1814_v61, 2  ;;  %v1821_v41 = vadd.f32 %v1820_v62, %v1819_v19  ;;  %v1841_v47 = vrot.slane %v1840_v35, 4  ;;  %v1750_v27 = vmul.f32 1.442695, %v1710_v30 }
 0x133   : > { %v3014_v49 = vpop.eup %2412  ;;  %v1802_v57 = vadd.f32 %v1801_v13, %v1800_v7  ;;  %v1808_v39 = vrot.slane %v1807_v14, 2  ;;  %v1828_v1 = vadd.f32 %v1827_v32, %v1826_v25  ;;  %v1833_v44 = vsel %vm1477_vm2, %v3012_v37, 0.0 }
 0x134   : > { %v1816_v40 = vadd.f32 %v1815_v38, %v1814_v61  ;;  %v1822_v4 = vrot.slane %v1821_v41, 2  ;;  %v1842_v33 = vadd.f32 %v1841_v47, %v1840_v35  ;;  %v1834_v43 = vrot.slane %v1833_v44, 4 }
 0x135   : > { %v1803_v11 = vrot.slane %v1802_v57, 1  ;;  %v1809_v12 = vadd.f32 %v1808_v39, %v1807_v14  ;;  %v1829_v18 = vrot.slane %v1828_v1, 2  ;;  %v1847_v19 = vsel %vm1477_vm2, %v3014_v49, 0.0 }
 0x136   : > { %v1817_v62 = vrot.slane %v1816_v40, 1  ;;  %v1823_v30 = vadd.f32 %v1822_v4, %v1821_v41  ;;  %v1843_v2 = vrot.slane %v1842_v33, 2  ;;  %v1835_v51 = vadd.f32 %v1834_v43, %v1833_v44 }
 0x137   : > { %v1804_v7 = vadd.f32 %v1803_v11, %v1802_v57  ;;  %v1810_v13 = vrot.slane %v1809_v12, 1  ;;  %v1830_v25 = vadd.f32 %v1829_v18, %v1828_v1  ;;  %v1848_v32 = vrot.slane %v1847_v19, 4 }
 0x138   : > { %v1818_v50 = vadd.f32 %v1817_v62, %v1816_v40  ;;  %v1824_v61 = vrot.slane %v1823_v30, 1  ;;  %v1844_v38 = vadd.f32 %v1843_v2, %v1842_v33  ;;  %v1836_v35 = vrot.slane %v1835_v51, 2 }
 0x139   : > { %2414 = vrcp.f32 %v1804_v7  ;;  %v1811_v47 = vadd.f32 %v1810_v13, %v1809_v12  ;;  %v1831_v14 = vrot.slane %v1830_v25, 1  ;;  %v1849_v39 = vadd.f32 %v1848_v32, %v1847_v19 }
 0x13a   : > { %2416 = vrcp.f32 %v1818_v50  ;;  %v1825_v46 = vadd.f32 %v1824_v61, %v1823_v30  ;;  %v1845_v45 = vrot.slane %v1844_v38, 1  ;;  %v1837_v29 = vadd.f32 %v1836_v35, %v1835_v51 }
 0x13b   : > { %2418 = vrcp.f32 %v1811_v47  ;;  %v1832_v41 = vadd.f32 %v1831_v14, %v1830_v25  ;;  %v1850_v44 = vrot.slane %v1849_v39, 2  ;;  %v1554_v57 = vmax.f32 %v1552_v5, %v1553_v20 }
 0x13c   : > { %2420 = vrcp.f32 %v1825_v46  ;;  %v1846_v1 = vadd.f32 %v1845_v45, %v1844_v38  ;;  %v1838_v40 = vrot.slane %v1837_v29, 1  ;;  %v1546_v2 = vrot.slane %v2999_v55, 1 }
 0x13d   : > { %2422 = vrcp.f32 %v1832_v41  ;;  %v1851_v4 = vadd.f32 %v1850_v44, %v1849_v39  ;;  %v1712_v33 = vsub.f32 %v2918_v15, %v1554_v57  ;;  %v3334_v50 = vrot.slane %v2964_v48, 2 }
 0x13e   : > { %2424 = vrcp.f32 %v1846_v1  ;;  %v1839_v43 = vadd.f32 %v1838_v40, %v1837_v29  ;;  %v1547_v5 = vmax.f32 %v2999_v55, %v1546_v2  ;;  %v1565_v46 = vrot.slane %v2993_v6, 2 }
 0x13f   : > { %v1559_v51 = vmax.f32 %v2964_v48, %v3334_v50  ;;  %v1852_v20 = vrot.slane %v1851_v4, 1  ;;  %2426 = vpow2.f32 %v1750_v27  ;;  %v1754_v45 = vmul.f32 1.442695, %v1712_v33 }
 0x140   : > { %2428 = vrcp.f32 %v1839_v43  ;;  %v1711_v15 = vsub.f32 %v2932_v21, %v1547_v5  ;;  %v1566_v12 = vmax.f32 %v2993_v6, %v1565_v46  ;;  %v1577_v48 = vrot.slane %v2974_v28, 4 }
 0x141   : > { %v1560_v11 = vrot.slane %v1559_v51, 1  ;;  %v1853_v29 = vadd.f32 %v1852_v20, %v1851_v4  ;;  %2430 = vpow2.f32 %v1754_v45  ;;  %v1569_v18 = vsel %vm1477_vm2, %v2978_v58, -inf }
 0x142   : > { %v1752_v27 = vmul.f32 1.442695, %v1711_v15  ;;  %v1567_v19 = vrot.slane %v1566_v12, 1  ;;  %v1578_v62 = vmax.f32 %v2974_v28, %v1577_v48  ;;  %v1570_v30 = vrot.slane %v1569_v18, 4 }
 0x143   : > { %v1561_v55 = vmax.f32 %v1559_v51, %v1560_v11  ;;  %v2415_v7 = vpop.eup %2414  ;;  %2432 = vrcp.f32 %v1853_v29  ;;  %v1583_v6 = vsel %vm1477_vm2, %v2982_v59, -inf  ;;  %v3044_v13 = vadd.f32 %v2897_v52, %v2839_v36 }
 0x144   : > { %v2417_v25 = vpop.eup %2416  ;;  %v2023_v32 = vmul.f32 %v2415_v7, %v2970_v54  ;;  %2434 = vpow2.f32 %v1752_v27  ;;  %v1568_v61 = vmax.f32 %v1566_v12, %v1567_v19  ;;  %v1579_v38 = vrot.slane %v1578_v62, 2 }
 0x145   : > { %v1713_v21 = vsub.f32 %v2936_v22, %v1561_v55  ;;  %v2419_v28 = vpop.eup %2418  ;;  %v2027_v35 = vmul.f32 %v2417_v25, %v2984_v0  ;;  %v1571_v14 = vmax.f32 %v1569_v18, %v1570_v30  ;;  %v1584_v22 = vrot.slane %v1583_v6, 4 }
 0x146   : > { %v2421_v39 = vpop.eup %2420  ;;  %v2025_v41 = vmul.f32 %v2419_v28, %v2989_v3  ;;  %v1714_v44 = vsub.f32 %v2952_v31, %v1568_v61  ;;  %v1580_v52 = vmax.f32 %v1578_v62, %v1579_v38  ;;  %v1590_v57 = vsel %vm1477_vm2, %v3044_v13, -inf }
 0x147   : > { %v1756_v47 = vmul.f32 1.442695, %v1713_v21  ;;  %v2423_v54 = vpop.eup %2422  ;;  %v2029_v0 = vmul.f32 %v2421_v39, %v2995_v34  ;;  %v1572_v1 = vrot.slane %v1571_v14, 2  ;;  %v1585_v40 = vmax.f32 %v1583_v6, %v1584_v22 }
 0x148   : > { %v2425_v2 = vpop.eup %2424  ;;  %v2118_v3 = vcombine.low %v2023_v32, %v2025_v41  ;;  %v2031_v31 = vmul.f32 %v2423_v54, %v3001_v56  ;;  %v1758_v4 = vmul.f32 1.442695, %v1714_v44  ;;  %v1581_v33 = vrot.slane %v1580_v52, 1 }
 0x149   : > { %2436 = vpow2.f32 %v1756_v47  ;;  %v3060_v50 = vpop.eup %2426  ;;  %v2119_v51 = vcombine.low %v2027_v35, %v2029_v0  ;;  %v2035_v43 = vmul.f32 %v2425_v2, %v3005_v8  ;;  %v1573_v5 = vmax.f32 %v1571_v14, %v1572_v1 }
 0x14a   : > { %v1586_v46 = vrot.slane %v1585_v40, 2  ;;  %v2429_v20 = vpop.eup %2428  ;;  %2150 = vst [vmem:[%s3056_s8] sm:$0x77] %v2118_v3  ;;  %v1854_v34 = vsel %vm1477_vm2, %v3060_v50, 0.0  ;;  %2438 = vpow2.f32 %v1758_v4  ;;  %v1582_v45 = vmax.f32 %v1580_v52, %v1581_v33 }
 0x14b   : > { %v1591_v11 = vrot.slane %v1590_v57, 4  ;;  %v3066_v15 = vpop.eup %2430  ;;  %2151 = vst [vmem:[%s3056_s8 + $0x8] sm:$0x77] %v2119_v51  ;;  %v2033_v56 = vmul.f32 %v2429_v20, %v3012_v37  ;;  %v1855_v12 = vrot.slane %v1854_v34, 4  ;;  %v1574_v48 = vrot.slane %v1573_v5, 1 }
 0x14c   : > { %v1587_v29 = vmax.f32 %v1585_v40, %v1586_v46  ;;  %v1868_v8 = vsel %vm1477_vm2, %v3066_v15, 0.0  ;;  %v1716_v55 = vsub.f32 %v2958_v42, %v1582_v45  ;;  %v3075_v27 = vadd.f32 %v2899_v53, %v2839_v36 }
 0x14d   : > { %v1592_v18 = vmax.f32 %v1590_v57, %v1591_v11  ;;  %v2433_v19 = vpop.eup %2432  ;;  %v2120_v62 = vcombine.low %v2031_v31, %v2033_v56  ;;  %v1856_v30 = vadd.f32 %v1855_v12, %v1854_v34  ;;  %v1869_v7 = vrot.slane %v1868_v8, 4 }
 0x14e   : > { %v1575_v21 = vmax.f32 %v1573_v5, %v1574_v48  ;;  %v3077_v37 = vpop.eup %2434  ;;  %v2037_v6 = vmul.f32 %v2433_v19, %v3014_v49  ;;  %v1762_v25 = vmul.f32 1.442695, %v1716_v55  ;;  %v1588_v32 = vrot.slane %v1587_v29, 1 }
 0x14f   : > { %v1593_v61 = vrot.slane %v1592_v18, 2  ;;  %2152 = vst [vmem:[%s3056_s8 + $0x10] sm:$0x77] %v2120_v62  ;;  %v1857_v42 = vrot.slane %v1856_v30, 2  ;;  %v1870_v38 = vadd.f32 %v1869_v7, %v1868_v8  ;;  %v1861_v53 = vsel %vm1477_vm2, %v3077_v37, 0.0 }
 0x150   : > { %v1715_v28 = vsub.f32 %v2978_v58, %v1575_v21  ;;  %v2121_v35 = vcombine.low %v2035_v43, %v2037_v6  ;;  %v1862_v47 = vrot.slane %v1861_v53, 4  ;;  %2440 = vpow2.f32 %v1762_v25 }
 0x151   : > { %v1589_v14 = vmax.f32 %v1587_v29, %v1588_v32  ;;  %v1858_v39 = vadd.f32 %v1857_v42, %v1856_v30  ;;  %v1871_v49 = vrot.slane %v1870_v38, 2  ;;  %v1594_v44 = vmax.f32 %v1592_v18, %v1593_v61 }
 0x152   : > { %v1760_v41 = vmul.f32 1.442695, %v1715_v28  ;;  %2153 = vst [vmem:[%s3056_s8 + $0x18] sm:$0x77] %v2121_v35  ;;  %v1863_v52 = vadd.f32 %v1862_v47, %v1861_v53  ;;  %v1604_v58 = vsel %vm1477_vm2, %v3075_v27, -inf  ;;  %v3099_v8 = vadd.f32 %v2903_v60, %v2839_v36 }
 0x153   : > { %v3084_v22 = vpop.eup %2436  ;;  %v1717_v54 = vsub.f32 %v2982_v59, %v1589_v14  ;;  %v1859_v0 = vrot.slane %v1858_v39, 1  ;;  %v1872_v1 = vadd.f32 %v1871_v49, %v1870_v38  ;;  %v1595_v4 = vrot.slane %v1594_v44, 1 }
 0x154   : > { %v1875_v57 = vsel %vm1477_vm2, %v3084_v22, 0.0  ;;  %2442 = vpow2.f32 %v1760_v41  ;;  %v3092_v2 = vpop.eup %2438  ;;  %v1864_v3 = vrot.slane %v1863_v52, 2  ;;  %v1605_v33 = vrot.slane %v1604_v58, 4 }
 0x155   : > { %v1876_v40 = vrot.slane %v1875_v57, 4  ;;  %v1764_v31 = vmul.f32 1.442695, %v1717_v54  ;;  %v1860_v51 = vadd.f32 %v1859_v0, %v1858_v39  ;;  %v1873_v43 = vrot.slane %v1872_v1, 1 }
 0x156   : > { %v1882_v46 = vsel %vm1477_vm2, %v3092_v2, 0.0  ;;  %v1865_v59 = vadd.f32 %v1864_v3, %v1863_v52  ;;  %v1596_v34 = vmax.f32 %v1594_v44, %v1595_v4  ;;  %v1606_v56 = vmax.f32 %v1604_v58, %v1605_v33 }
 0x157   : > { %v1877_v5 = vadd.f32 %v1876_v40, %v1875_v57  ;;  %v1883_v20 = vrot.slane %v1882_v46, 4  ;;  %2444 = vpow2.f32 %v1764_v31  ;;  %v1874_v45 = vadd.f32 %v1873_v43, %v1872_v1 }
 0x158   : > { %2446 = vrcp.f32 %v1860_v51  ;;  %v1866_v12 = vrot.slane %v1865_v59, 1  ;;  %v1718_v29 = vsub.f32 %v3044_v13, %v1596_v34  ;;  %v1607_v18 = vrot.slane %v1606_v56, 2 }
 0x159   : > { %v1878_v11 = vrot.slane %v1877_v5, 2  ;;  %v1884_v48 = vadd.f32 %v1883_v20, %v1882_v46  ;;  %2448 = vrcp.f32 %v1874_v45  ;;  %v3103_v19 = vadd.f32 %v2905_v63, %v2839_v36 }
 0x15a   : > { %v3105_v62 = vpop.eup %2440  ;;  %v1867_v30 = vadd.f32 %v1866_v12, %v1865_v59  ;;  %v1766_v21 = vmul.f32 1.442695, %v1718_v29  ;;  %v1597_v6 = vsel %vm1477_vm2, %v3099_v8, -inf  ;;  %v1608_v25 = vmax.f32 %v1606_v56, %v1607_v18 }
 0x15b   : > { %v1879_v55 = vadd.f32 %v1878_v11, %v1877_v5  ;;  %v1885_v7 = vrot.slane %v1884_v48, 2  ;;  %v1896_v60 = vsel %vm1477_vm2, %v3105_v62, 0.0  ;;  %v1598_v32 = vrot.slane %v1597_v6, 4 }
 0x15c   : > { %2450 = vrcp.f32 %v1867_v30  ;;  %v1897_v42 = vrot.slane %v1896_v60, 4  ;;  %v1611_v63 = vsel %vm1477_vm2, %v3103_v19, -inf  ;;  %v1609_v28 = vrot.slane %v1608_v25, 1 }
 0x15d   : > { %v1880_v13 = vrot.slane %v1879_v55, 1  ;;  %v1886_v61 = vadd.f32 %v1885_v7, %v1884_v48  ;;  %2452 = vpow2.f32 %v1766_v21  ;;  %v1599_v35 = vmax.f32 %v1597_v6, %v1598_v32 }
 0x15e   : > { %v3113_v38 = vpop.eup %2442  ;;  %v1898_v14 = vadd.f32 %v1897_v42, %v1896_v60  ;;  %v1612_v49 = vrot.slane %v1611_v63, 4  ;;  %v1610_v44 = vmax.f32 %v1608_v25, %v1609_v28  ;;  %v3121_v1 = vadd.f32 %v2912_v9, %v2839_v36 }
 0x15f   : > { %v1881_v53 = vadd.f32 %v1880_v13, %v1879_v55  ;;  %v1887_v47 = vrot.slane %v1886_v61, 1  ;;  %v1889_v39 = vsel %vm1477_vm2, %v3113_v38, 0.0  ;;  %v1600_v52 = vrot.slane %v1599_v35, 2 }
 0x160   : > { %v1890_v41 = vrot.slane %v1889_v39, 4  ;;  %v1899_v58 = vrot.slane %v1898_v14, 2  ;;  %v1613_v0 = vmax.f32 %v1611_v63, %v1612_v49  ;;  %v1720_v4 = vsub.f32 %v3075_v27, %v1610_v44 }
 0x161   : > { %2454 = vrcp.f32 %v1881_v53  ;;  %v3117_v57 = vpop.eup %2444  ;;  %v1888_v54 = vadd.f32 %v1887_v47, %v1886_v61  ;;  %v1601_v33 = vmax.f32 %v1599_v35, %v1600_v52  ;;  %v1618_v12 = vsel %vm1477_vm2, %v3121_v1, -inf }
 0x162   : > { %v2447_v40 = vpop.eup %2446  ;;  %v1891_v3 = vadd.f32 %v1890_v41, %v1889_v39  ;;  %v1903_v31 = vsel %vm1477_vm2, %v3117_v57, 0.0  ;;  %v1900_v43 = vadd.f32 %v1899_v58, %v1898_v14  ;;  %v1770_v20 = vmul.f32 1.442695, %v1720_v4 }
 0x163   : > { %v2039_v51 = vmul.f32 %v2447_v40, %v3060_v50  ;;  %2456 = vrcp.f32 %v1888_v54  ;;  %v1904_v5 = vrot.slane %v1903_v31, 4  ;;  %v2449_v46 = vpop.eup %2448  ;;  %v1602_v34 = vrot.slane %v1601_v33, 1 }
 0x164   : > { %v1892_v59 = vrot.slane %v1891_v3, 2  ;;  %v1614_v45 = vrot.slane %v1613_v0, 2  ;;  %v2043_v9 = vmul.f32 %v2449_v46, %v3066_v15  ;;  %v1901_v11 = vrot.slane %v1900_v43, 1 }
 0x165   : > { %v1905_v56 = vadd.f32 %v1904_v5, %v1903_v31  ;;  %2458 = vpow2.f32 %v1770_v20  ;;  %v1603_v27 = vmax.f32 %v1601_v33, %v1602_v34  ;;  %v1619_v30 = vrot.slane %v1618_v12, 4 }
 0x166   : > { %v1893_v48 = vadd.f32 %v1892_v59, %v1891_v3  ;;  %v1615_v29 = vmax.f32 %v1613_v0, %v1614_v45  ;;  %v2451_v50 = vpop.eup %2450  ;;  %v1902_v55 = vadd.f32 %v1901_v11, %v1900_v43  ;;  %v3132_v7 = vadd.f32 %v2914_v10, %v2839_v36 }
 0x167   : > { %v1906_v18 = vrot.slane %v1905_v56, 2  ;;  %v3134_v21 = vpop.eup %2452  ;;  %v2041_v15 = vmul.f32 %v2451_v50, %v3077_v37  ;;  %v1719_v13 = vsub.f32 %v3099_v8, %v1603_v27  ;;  %v1620_v61 = vmax.f32 %v1618_v12, %v1619_v30 }
 0x168   : > { %v1894_v6 = vrot.slane %v1893_v48, 1  ;;  %v1616_v60 = vrot.slane %v1615_v29, 1  ;;  %2460 = vrcp.f32 %v1902_v55  ;;  %v1910_v32 = vsel %vm1477_vm2, %v3134_v21, 0.0 }
 0x169   : > { %v1907_v25 = vadd.f32 %v1906_v18, %v1905_v56  ;;  %v2122_v63 = vcombine.low %v2039_v51, %v2041_v15  ;;  %v1911_v10 = vrot.slane %v1910_v32, 4  ;;  %v1768_v28 = vmul.f32 1.442695, %v1719_v13 }
 0x16a   : > { %v1895_v53 = vadd.f32 %v1894_v6, %v1893_v48  ;;  %v1617_v37 = vmax.f32 %v1615_v29, %v1616_v60  ;;  %v1621_v14 = vrot.slane %v1620_v61, 2  ;;  %v1632_v39 = vsel %vm1477_vm2, %v3132_v7, -inf }
 0x16b   : > { %v2455_v42 = vpop.eup %2454  ;;  %v1908_v47 = vrot.slane %v1907_v25, 1  ;;  %2154 = vst [vmem:[%s3056_s8 + $0x20] sm:$0x77] %v2122_v63  ;;  %v1912_v8 = vadd.f32 %v1911_v10, %v1910_v32  ;;  %v3146_v49 = vadd.f32 %v2920_v16, %v2839_v36  ;;  %v1633_v40 = vrot.slane %v1632_v39, 4 }
 0x16c   : > { %v2045_v35 = vmul.f32 %v2455_v42, %v3084_v22  ;;  %2462 = vrcp.f32 %v1895_v53  ;;  %v1721_v22 = vsub.f32 %v3103_v19, %v1617_v37  ;;  %v1622_v0 = vmax.f32 %v1620_v61, %v1621_v14 }
 0x16d   : > { %v2457_v41 = vpop.eup %2456  ;;  %v1909_v52 = vadd.f32 %v1908_v47, %v1907_v25  ;;  %2464 = vpow2.f32 %v1768_v28  ;;  %v1913_v58 = vrot.slane %v1912_v8, 2  ;;  %v1625_v31 = vsel %vm1477_vm2, %v3146_v49, -inf }
 0x16e   : > { %v2123_v44 = vcombine.low %v2043_v9, %v2045_v35  ;;  %v2047_v54 = vmul.f32 %v2457_v41, %v3092_v2  ;;  %v1772_v3 = vmul.f32 1.442695, %v1721_v22  ;;  %v3155_v16 = vadd.f32 %v2922_v17, %v2839_v36 }
 0x16f   : > { %2466 = vrcp.f32 %v1909_v52  ;;  %v3157_v4 = vpop.eup %2458  ;;  %v1914_v33 = vadd.f32 %v1913_v58, %v1912_v8  ;;  %v1623_v51 = vrot.slane %v1622_v0, 1  ;;  %v1634_v19 = vmax.f32 %v1632_v39, %v1633_v40 }
 0x170   : > { %2155 = vst [vmem:[%s3056_s8 + $0x28] sm:$0x77] %v2123_v44  ;;  %v1626_v43 = vrot.slane %v1625_v31, 4  ;;  %v1924_v2 = vsel %vm1477_vm2, %v3157_v4, 0.0  ;;  %2468 = vpow2.f32 %v1772_v3  ;;  %v1639_v5 = vsel %vm1477_vm2, %v3155_v16, -inf }
 0x171   : > { %v3165_v46 = vadd.f32 %v2938_v23, %v2839_v36  ;;  %v1915_v59 = vrot.slane %v1914_v33, 1  ;;  %v1925_v17 = vrot.slane %v1924_v2, 4  ;;  %v1624_v20 = vmax.f32 %v1622_v0, %v1623_v51 }
 0x172   : > { %v1635_v34 = vrot.slane %v1634_v19, 2  ;;  %v2461_v45 = vpop.eup %2460  ;;  %v1627_v9 = vmax.f32 %v1625_v31, %v1626_v43  ;;  %v1640_v11 = vrot.slane %v1639_v5, 4  ;;  %v3171_v12 = vadd.f32 %v2940_v24, %v2839_v36 }
 0x173   : > { %v1646_v56 = vsel %vm1477_vm2, %v3165_v46, -inf  ;;  %v2051_v48 = vmul.f32 %v2461_v45, %v3105_v62  ;;  %v1916_v27 = vadd.f32 %v1915_v59, %v1914_v33  ;;  %v1926_v29 = vadd.f32 %v1925_v17, %v1924_v2 }
 0x174   : > { %v1722_v23 = vsub.f32 %v3121_v1, %v1624_v20  ;;  %v1636_v50 = vmax.f32 %v1634_v19, %v1635_v34  ;;  %v1628_v55 = vrot.slane %v1627_v9, 2  ;;  %v1641_v18 = vmax.f32 %v1639_v5, %v1640_v11 }
 0x175   : > { %v1647_v30 = vrot.slane %v1646_v56, 4  ;;  %2470 = vrcp.f32 %v1916_v27  ;;  %v1927_v6 = vrot.slane %v1926_v29, 2  ;;  %v1660_v60 = vsel %vm1477_vm2, %v3171_v12, -inf }
 0x176   : > { %v2463_v15 = vpop.eup %2462  ;;  %v1774_v13 = vmul.f32 1.442695, %v1722_v23  ;;  %v1637_v62 = vrot.slane %v1636_v50, 1  ;;  %v1629_v32 = vmax.f32 %v1627_v9, %v1628_v55  ;;  %v1642_v61 = vrot.slane %v1641_v18, 2 }
 0x177   : > { %v3177_v25 = vpop.eup %2464  ;;  %v2049_v24 = vmul.f32 %v2463_v15, %v3113_v38  ;;  %v1928_v1 = vadd.f32 %v1927_v6, %v1926_v29  ;;  %v1648_v63 = vmax.f32 %v1646_v56, %v1647_v30  ;;  %v1661_v22 = vrot.slane %v1660_v60, 4 }
 0x178   : > { %v1917_v42 = vsel %vm1477_vm2, %v3177_v25, 0.0  ;;  %2472 = vpow2.f32 %v1774_v13  ;;  %v1638_v35 = vmax.f32 %v1636_v50, %v1637_v62  ;;  %v1630_v47 = vrot.slane %v1629_v32, 1  ;;  %v3335_v13 = vld [vmem:[#allocation5_spill] sm:$0xff] }
 0x179   : > { %v2467_v53 = vpop.eup %2466  ;;  %v2124_v10 = vcombine.low %v2047_v54, %v2049_v24  ;;  %v1918_v28 = vrot.slane %v1917_v42, 4  ;;  %v1929_v14 = vrot.slane %v1928_v1, 1  ;;  %v1643_v8 = vmax.f32 %v1641_v18, %v1642_v61  ;;  %v3336_v61 = vld [vmem:[#allocation6_spill] sm:$0xff] }
 0x17a   : > { %v2053_v37 = vmul.f32 %v2467_v53, %v3117_v57  ;;  %v1649_v38 = vrot.slane %v1648_v63, 2  ;;  %v3183_v39 = vpop.eup %2468  ;;  %v1724_v44 = vsub.f32 %v3132_v7, %v1638_v35  ;;  %v1631_v52 = vmax.f32 %v1629_v32, %v1630_v47  ;;  %v3337_v53 = vld [vmem:[#allocation7_spill] sm:$0xff] }
 0x17b   : > { %2156 = vst [vmem:[%s3056_s8 + $0x30] sm:$0x77] %v2124_v10  ;;  %v1919_v41 = vadd.f32 %v1918_v28, %v1917_v42  ;;  %v1930_v0 = vadd.f32 %v1929_v14, %v1928_v1  ;;  %v1931_v54 = vsel %vm1477_vm2, %v3183_v39, 0.0  ;;  %v1644_v40 = vrot.slane %v1643_v8, 1 }
 0x17c   : > { %v2125_v58 = vcombine.low %v2051_v48, %v2053_v37  ;;  %v1932_v57 = vrot.slane %v1931_v54, 4  ;;  %v1778_v31 = vmul.f32 1.442695, %v1724_v44  ;;  %v1723_v33 = vsub.f32 %v3146_v49, %v1631_v52 }
 0x17d   : > { %v1920_v3 = vrot.slane %v1919_v41, 2  ;;  %2474 = vrcp.f32 %v1930_v0  ;;  %v1645_v51 = vmax.f32 %v1643_v8, %v1644_v40  ;;  %v1650_v19 = vmax.f32 %v1648_v63, %v1649_v38 }
 0x17e   : > { %2157 = vst [vmem:[%s3056_s8 + $0x38] sm:$0x77] %v2125_v58  ;;  %v1662_v43 = vmax.f32 %v1660_v60, %v1661_v22  ;;  %v1933_v7 = vadd.f32 %v1932_v57, %v1931_v54  ;;  %2476 = vpow2.f32 %v1778_v31  ;;  %v1776_v5 = vmul.f32 1.442695, %v1723_v33 }
 0x17f   : > { %v1921_v2 = vadd.f32 %v1920_v3, %v1919_v41  ;;  %v2471_v59 = vpop.eup %2470  ;;  %v1725_v17 = vsub.f32 %v3155_v16, %v1645_v51  ;;  %v1651_v20 = vrot.slane %v1650_v19, 1  ;;  %v3194_v45 = vadd.f32 %v2942_v26, %v2839_v36 }
 0x180   : > { %v1663_v34 = vrot.slane %v1662_v43, 2  ;;  %v3197_v49 = vmul.f32 %v2471_v59, %v3134_v21  ;;  %v1934_v11 = vrot.slane %v1933_v7, 2  ;;  %2478 = vpow2.f32 %v1776_v5 }
 0x181   : > { %v1922_v9 = vrot.slane %v1921_v2, 1  ;;  %v1780_v48 = vmul.f32 1.442695, %v1725_v17  ;;  %v1652_v27 = vmax.f32 %v1650_v19, %v1651_v20  ;;  %v1653_v16 = vsel %vm1477_vm2, %v3194_v45, -inf  ;;  %v3338_v17 = vld [vmem:[#allocation8_spill] sm:$0xff] }
 0x182   : > { %v3199_v56 = vpop.eup %2472  ;;  %v1664_v29 = vmax.f32 %v1662_v43, %v1663_v34  ;;  %v1935_v50 = vadd.f32 %v1934_v11, %v1933_v7  ;;  %v1654_v55 = vrot.slane %v1653_v16, 4  ;;  %v3208_v60 = vadd.f32 %v3335_v13, %v2839_v36 }
 0x183   : > { %v1923_v23 = vadd.f32 %v1922_v9, %v1921_v2  ;;  %v1938_v26 = vsel %vm1477_vm2, %v3199_v56, 0.0  ;;  %2480 = vpow2.f32 %v1780_v48  ;;  %v1726_v21 = vsub.f32 %v3165_v46, %v1652_v27 }
 0x184   : > { %v1939_v18 = vrot.slane %v1938_v26, 4  ;;  %v1665_v30 = vrot.slane %v1664_v29, 1  ;;  %v1936_v15 = vrot.slane %v1935_v50, 1  ;;  %v1655_v6 = vmax.f32 %v1653_v16, %v1654_v55 }
 0x185   : > { %2482 = vrcp.f32 %v1923_v23  ;;  %v1782_v62 = vmul.f32 1.442695, %v1726_v21  ;;  %v3212_v1 = vadd.f32 %v3336_v61, %v2839_v36  ;;  %v1667_v46 = vsel %vm1477_vm2, %v3208_v60, -inf }
 0x186   : > { %v1940_v24 = vadd.f32 %v1939_v18, %v1938_v26  ;;  %v1666_v32 = vmax.f32 %v1664_v29, %v1665_v30  ;;  %v1937_v42 = vadd.f32 %v1936_v15, %v1935_v50  ;;  %v1656_v63 = vrot.slane %v1655_v6, 2 }
 0x187   : > { %v3218_v10 = vadd.f32 %v3337_v53, %v2839_v36  ;;  %v2475_v28 = vpop.eup %2474  ;;  %2484 = vpow2.f32 %v1782_v62  ;;  %v1668_v37 = vrot.slane %v1667_v46, 4  ;;  %v1674_v41 = vsel %vm1477_vm2, %v3212_v1, -inf }
 0x188   : > { %v1941_v35 = vrot.slane %v1940_v24, 2  ;;  %v1728_v47 = vsub.f32 %v3171_v12, %v1666_v32  ;;  %v3221_v14 = vpop.eup %2476  ;;  %v3224_v8 = vmul.f32 %v2475_v28, %v3157_v4  ;;  %2486 = vrcp.f32 %v1937_v42 }
 0x189   : > { %v1657_v38 = vmax.f32 %v1655_v6, %v1656_v63  ;;  %v1952_v52 = vsel %vm1477_vm2, %v3221_v14, 0.0  ;;  %v1669_v58 = vmax.f32 %v1667_v46, %v1668_v37  ;;  %v1675_v40 = vrot.slane %v1674_v41, 4 }
 0x18a   : > { %v1942_v44 = vadd.f32 %v1941_v35, %v1940_v24  ;;  %v1786_v22 = vmul.f32 1.442695, %v1728_v47  ;;  %v3230_v0 = vpop.eup %2478  ;;  %v1953_v12 = vrot.slane %v1952_v52, 4  ;;  %v1688_v4 = vsel %vm1477_vm2, %v3218_v10, -inf }
 0x18b   : > { %v1658_v54 = vrot.slane %v1657_v38, 1  ;;  %v1945_v57 = vsel %vm1477_vm2, %v3230_v0, 0.0  ;;  %v1670_v31 = vrot.slane %v1669_v58, 2  ;;  %v1676_v43 = vmax.f32 %v1674_v41, %v1675_v40 }
 0x18c   : > { %v1943_v3 = vrot.slane %v1942_v44, 1  ;;  %2488 = vpow2.f32 %v1786_v22  ;;  %v1954_v33 = vadd.f32 %v1953_v12, %v1952_v52  ;;  %v1946_v51 = vrot.slane %v1945_v57, 4 }
 0x18d   : > { %v1659_v19 = vmax.f32 %v1657_v38, %v1658_v54  ;;  %v3236_v2 = vpop.eup %2480  ;;  %v1671_v5 = vmax.f32 %v1669_v58, %v1670_v31  ;;  %v1689_v59 = vrot.slane %v1688_v4, 4  ;;  %v3240_v20 = vadd.f32 %v3338_v17, %v2839_v36 }
 0x18e   : > { %v1944_v7 = vadd.f32 %v1943_v3, %v1942_v44  ;;  %v1955_v9 = vrot.slane %v1954_v33, 2  ;;  %v1947_v11 = vadd.f32 %v1946_v51, %v1945_v57  ;;  %v1959_v48 = vsel %vm1477_vm2, %v3236_v2, 0.0 }
 0x18f   : > { %v2483_v34 = vpop.eup %2482  ;;  %v1727_v27 = vsub.f32 %v3194_v45, %v1659_v19  ;;  %v1960_v16 = vrot.slane %v1959_v48, 4  ;;  %v1672_v23 = vrot.slane %v1671_v5, 1  ;;  %v1677_v18 = vrot.slane %v1676_v43, 2  ;;  %v3339_v19 = vld [vmem:[#allocation9_spill] sm:$0xff] }
 0x190   : > { %v2057_v29 = vmul.f32 %v2483_v34, %v3177_v25  ;;  %2490 = vrcp.f32 %v1944_v7  ;;  %v1956_v50 = vadd.f32 %v1955_v9, %v1954_v33  ;;  %v1948_v26 = vrot.slane %v1947_v11, 2 }
 0x191   : > { %v1784_v55 = vmul.f32 1.442695, %v1727_v27  ;;  %v3246_v21 = vpop.eup %2484  ;;  %v1961_v15 = vadd.f32 %v1960_v16, %v1959_v48  ;;  %v1673_v6 = vmax.f32 %v1671_v5, %v1672_v23  ;;  %v1690_v13 = vmax.f32 %v1688_v4, %v1689_v59 }
 0x192   : > { %v2126_v30 = vcombine.low %v3197_v49, %v2057_v29  ;;  %v2487_v24 = vpop.eup %2486  ;;  %v1957_v62 = vrot.slane %v1956_v50, 1  ;;  %v1949_v45 = vadd.f32 %v1948_v26, %v1947_v11  ;;  %v1966_v25 = vsel %vm1477_vm2, %v3246_v21, 0.0 }
 0x193   : > { %2492 = vpow2.f32 %v1784_v55  ;;  %v2061_v32 = vmul.f32 %v2487_v24, %v3183_v39  ;;  %v1962_v61 = vrot.slane %v1961_v15, 2  ;;  %v1967_v42 = vrot.slane %v1966_v25, 4 }
 0x194   : > { %2158 = vst [vmem:[%s3056_s8 + $0x40] sm:$0x77] %v2126_v30  ;;  %v1729_v63 = vsub.f32 %v3208_v60, %v1673_v6  ;;  %v1958_v46 = vadd.f32 %v1957_v62, %v1956_v50  ;;  %v1950_v49 = vrot.slane %v1949_v45, 1  ;;  %v1678_v53 = vmax.f32 %v1676_v43, %v1677_v18 }
 0x195   : > { %v1691_v28 = vrot.slane %v1690_v13, 2  ;;  %v2127_v47 = vcombine.low %v3224_v8, %v2061_v32  ;;  %v1963_v37 = vadd.f32 %v1962_v61, %v1961_v15  ;;  %v1968_v38 = vadd.f32 %v1967_v42, %v1966_v25 }
 0x196   : > { %v3254_v35 = vpop.eup %2488  ;;  %v1788_v41 = vmul.f32 1.442695, %v1729_v63  ;;  %2494 = vrcp.f32 %v1958_v46  ;;  %v1951_v44 = vadd.f32 %v1950_v49, %v1949_v45  ;;  %v1679_v52 = vrot.slane %v1678_v53, 1 }
 0x197   : > { %v1980_v39 = vsel %vm1477_vm2, %v3254_v35, 0.0  ;;  %2159 = vst [vmem:[%s3056_s8 + $0x48] sm:$0x77] %v2127_v47  ;;  %v1964_v22 = vrot.slane %v1963_v37, 1  ;;  %v1969_v60 = vrot.slane %v1968_v38, 2  ;;  %v1692_v54 = vmax.f32 %v1690_v13, %v1691_v28 }
 0x198   : > { %v1981_v58 = vrot.slane %v1980_v39, 4  ;;  %2496 = vpow2.f32 %v1788_v41  ;;  %v1680_v12 = vmax.f32 %v1678_v53, %v1679_v52  ;;  %v1681_v8 = vsel %vm1477_vm2, %v3240_v20, -inf }
 0x199   : > { %2498 = vrcp.f32 %v1951_v44  ;;  %v1965_v4 = vadd.f32 %v1964_v22, %v1963_v37  ;;  %v1970_v3 = vadd.f32 %v1969_v60, %v1968_v38  ;;  %v1682_v31 = vrot.slane %v1681_v8, 4 }
 0x19a   : > { %v2491_v40 = vpop.eup %2490  ;;  %v1982_v57 = vadd.f32 %v1981_v58, %v1980_v39  ;;  %v1730_v33 = vsub.f32 %v3212_v1, %v1680_v12  ;;  %v1693_v51 = vrot.slane %v1692_v54, 1  ;;  %v3265_v43 = vadd.f32 %v3339_v19, %v2839_v36 }
 0x19b   : > { %2500 = vrcp.f32 %v1965_v4  ;;  %v1683_v5 = vmax.f32 %v1681_v8, %v1682_v31  ;;  %v1971_v11 = vrot.slane %v1970_v3, 1  ;;  %v2063_v15 = vmul.f32 %v2491_v40, %v3199_v56 }
 0x19c   : > { %v1983_v7 = vrot.slane %v1982_v57, 2  ;;  %v1790_v17 = vmul.f32 1.442695, %v1730_v33  ;;  %v1694_v34 = vmax.f32 %v1692_v54, %v1693_v51  ;;  %v1695_v9 = vsel %vm1477_vm2, %v3265_v43, -inf }
 0x19d   : > { %v3267_v59 = vpop.eup %2492  ;;  %v1684_v1 = vrot.slane %v1683_v5, 2  ;;  %v1696_v29 = vrot.slane %v1695_v9, 4  ;;  %v1972_v6 = vadd.f32 %v1971_v11, %v1970_v3 }
 0x19e   : > { %v1973_v48 = vsel %vm1477_vm2, %v3267_v59, 0.0  ;;  %2502 = vpow2.f32 %v1790_v17  ;;  %v1732_v36 = vsub.f32 %v3218_v10, %v1694_v34  ;;  %v1984_v16 = vadd.f32 %v1983_v7, %v1982_v57 }
 0x19f   : > { %v1974_v27 = vrot.slane %v1973_v48, 4  ;;  %v1685_v23 = vmax.f32 %v1683_v5, %v1684_v1  ;;  %v1697_v18 = vmax.f32 %v1695_v9, %v1696_v29 }
 0x1a0   : > { %v2495_v50 = vpop.eup %2494  ;;  %v1794_v55 = vmul.f32 1.442695, %v1732_v36  ;;  %v1985_v32 = vrot.slane %v1984_v16, 1 }
 0x1a1   : > { %v1975_v26 = vadd.f32 %v1974_v27, %v1973_v48  ;;  %v1686_v13 = vrot.slane %v1685_v23, 1  ;;  %v1698_v10 = vrot.slane %v1697_v18, 2  ;;  %v2067_v63 = vmul.f32 %v2495_v50, %v3221_v14 }
 0x1a2   : > { %v3274_v30 = vpop.eup %2496  ;;  %2504 = vpow2.f32 %v1794_v55 }
 0x1a3   : > { %v2499_v24 = vpop.eup %2498  ;;  %v1976_v62 = vrot.slane %v1975_v26, 2  ;;  %v1987_v45 = vsel %vm1477_vm2, %v3274_v30, 0.0  ;;  %v1687_v42 = vmax.f32 %v1685_v23, %v1686_v13  ;;  %v1699_v49 = vmax.f32 %v1697_v18, %v1698_v10 }
 0x1a4   : > { %v2065_v25 = vmul.f32 %v2499_v24, %v3230_v0  ;;  %v1988_v61 = vrot.slane %v1987_v45, 4  ;;  %2506 = vrcp.f32 %v1972_v6  ;;  %v1986_v0 = vadd.f32 %v1985_v32, %v1984_v16 }
 0x1a5   : > { %v1977_v46 = vadd.f32 %v1976_v62, %v1975_v26  ;;  %v2501_v56 = vpop.eup %2500  ;;  %v1731_v47 = vsub.f32 %v3240_v20, %v1687_v42  ;;  %v1700_v41 = vrot.slane %v1699_v49, 1 }
 0x1a6   : > { %v2128_v53 = vcombine.low %v2063_v15, %v2065_v25  ;;  %v1989_v28 = vadd.f32 %v1988_v61, %v1987_v45  ;;  %v2069_v37 = vmul.f32 %v2501_v56, %v3236_v2 }
 0x1a7   : > { %v1978_v38 = vrot.slane %v1977_v46, 1  ;;  %v1792_v39 = vmul.f32 1.442695, %v1731_v47  ;;  %v1701_v60 = vmax.f32 %v1699_v49, %v1700_v41 }
 0x1a8   : > { %2160 = vst [vmem:[%s3056_s8 + $0x50] sm:$0x77] %v2128_v53  ;;  %v1990_v44 = vrot.slane %v1989_v28, 2  ;;  %v3284_v52 = vpop.eup %2502  ;;  %v2129_v14 = vcombine.low %v2067_v63, %v2069_v37 }
 0x1a9   : > { %v1979_v22 = vadd.f32 %v1978_v38, %v1977_v46  ;;  %v1994_v12 = vsel %vm1477_vm2, %v3284_v52, 0.0  ;;  %2508 = vpow2.f32 %v1792_v39  ;;  %v1733_v20 = vsub.f32 %v3265_v43, %v1701_v60 }
 0x1aa   : > { %v1991_v58 = vadd.f32 %v1990_v44, %v1989_v28  ;;  %2161 = vst [vmem:[%s3056_s8 + $0x58] sm:$0x77] %v2129_v14  ;;  %v1995_v2 = vrot.slane %v1994_v12, 4 }
 0x1ab   : > { %2510 = vrcp.f32 %v1979_v22  ;;  %v1796_v4 = vmul.f32 1.442695, %v1733_v20 }
 0x1ac   : > { %2512 = vrcp.f32 %v1986_v0  ;;  %v1992_v54 = vrot.slane %v1991_v58, 1  ;;  %v2505_v8 = vpop.eup %2504  ;;  %v1996_v40 = vadd.f32 %v1995_v2, %v1994_v12 }
 0x1ad   : > { %v2008_v57 = vsel %vm1477_vm2, %v2505_v8, 0.0  ;;  %2514 = vpow2.f32 %v1796_v4 }
 0x1ae   : > { %v1993_v3 = vadd.f32 %v1992_v54, %v1991_v58  ;;  %v1997_v31 = vrot.slane %v1996_v40, 2  ;;  %v2009_v33 = vrot.slane %v2008_v57, 4  ;;  %v2507_v51 = vpop.eup %2506 }
 0x1af   : > { %v2071_v43 = vmul.f32 %v2507_v51, %v3246_v21 }
 0x1b0   : > { %2516 = vrcp.f32 %v1993_v3  ;;  %v2010_v19 = vadd.f32 %v2009_v33, %v2008_v57  ;;  %v1998_v7 = vadd.f32 %v1997_v31, %v1996_v40 }
 0x1b2   : > { %v2011_v5 = vrot.slane %v2010_v19, 2  ;;  %v1999_v1 = vrot.slane %v1998_v7, 1 }
 0x1b3   : > { %v2509_v17 = vpop.eup %2508 }
 0x1b4   : > { %v2001_v9 = vsel %vm1477_vm2, %v2509_v17, 0.0  ;;  %v2012_v36 = vadd.f32 %v2011_v5, %v2010_v19  ;;  %v2000_v55 = vadd.f32 %v1999_v1, %v1998_v7 }
 0x1b5   : > { %v2511_v34 = vpop.eup %2510  ;;  %v2002_v27 = vrot.slane %v2001_v9, 4 }
 0x1b6   : > { %v2513_v11 = vpop.eup %2512  ;;  %v2073_v48 = vmul.f32 %v2511_v34, %v3267_v59  ;;  %v2013_v6 = vrot.slane %v2012_v36, 1  ;;  %2518 = vrcp.f32 %v2000_v55 }
 0x1b7   : > { %v2003_v16 = vadd.f32 %v2002_v27, %v2001_v9  ;;  %v2515_v23 = vpop.eup %2514  ;;  %v2075_v50 = vmul.f32 %v2513_v11, %v3254_v35 }
 0x1b8   : > { %v2130_v29 = vcombine.low %v2071_v43, %v2073_v48  ;;  %v2015_v21 = vsel %vm1477_vm2, %v2515_v23, 0.0  ;;  %v2014_v10 = vadd.f32 %v2013_v6, %v2012_v36 }
 0x1b9   : > { %v2004_v18 = vrot.slane %v2003_v16, 2  ;;  %v2016_v13 = vrot.slane %v2015_v21, 4 }
 0x1ba   : > { %v2517_v26 = vpop.eup %2516  ;;  %2162 = vst [vmem:[%s3056_s8 + $0x60] sm:$0x77] %v2130_v29 }
 0x1bb   : > { %v2077_v15 = vmul.f32 %v2517_v26, %v3274_v30  ;;  %v2005_v59 = vadd.f32 %v2004_v18, %v2003_v16  ;;  %v2017_v62 = vadd.f32 %v2016_v13, %v2015_v21 }
 0x1bd   : > { %v2131_v24 = vcombine.low %v2075_v50, %v2077_v15  ;;  %v2006_v45 = vrot.slane %v2005_v59, 1  ;;  %v2018_v25 = vrot.slane %v2017_v62, 2 }
 0x1bf   : > { %2163 = vst [vmem:[%s3056_s8 + $0x68] sm:$0x77] %v2131_v24  ;;  %v2007_v35 = vadd.f32 %v2006_v45, %v2005_v59  ;;  %v2019_v32 = vadd.f32 %v2018_v25, %v2017_v62 }
 0x1c0   : > { %v2519_v30 = vpop.eup %2518 }
 0x1c1   : > { %2520 = vrcp.f32 %v2007_v35  ;;  %v2020_v61 = vrot.slane %v2019_v32, 1  ;;  %v2079_v63 = vmul.f32 %v2519_v30, %v3284_v52 }
 0x1c2   : > { %2522 = vrcp.f32 %v2014_v10 }
 0x1c3   : > { %v2021_v42 = vadd.f32 %v2020_v61, %v2019_v32 }
 0x1c5   : > { %2524 = vrcp.f32 %v2021_v42 }
 0x1cb   : > { %v2521_v46 = vpop.eup %2520 }
 0x1cc   : > { %v2523_v49 = vpop.eup %2522  ;;  %v2081_v56 = vmul.f32 %v2521_v46, %v2509_v17 }
 0x1cd   : > { %v2083_v28 = vmul.f32 %v2523_v49, %v2505_v8 }
 0x1ce   : > { %v2132_v53 = vcombine.low %v2079_v63, %v2081_v56 }
 0x1cf   : > { %v2525_v47 = vpop.eup %2524 }
 0x1d0   : > { %2164 = vst [vmem:[%s3056_s8 + $0x70] sm:$0x77] %v2132_v53  ;;  %v2085_v37 = vmul.f32 %v2525_v47, %v2515_v23 }
 0x1d2   : > { %v2133_v38 = vcombine.low %v2083_v28, %v2085_v37 }
 0x1d4   : > { %2165 = vst [vmem:[%s3056_s8 + $0x78] sm:$0x77] %v2133_v38 }
 0x1d5 PF: > { %s16_s17 = sadd.s32 1, %s2606_s17   ;;  %s3340_s12 = smov %s2590_s13 }
 0x1d6   : > { %p13_p9 = scmp.ge.s32.totalorder %s16_s17, 4   ;;  %s3341_s13 = smov %s2594_s14 }
 0x1d7   : > { %s3342_s14 = smov %s2680_s24  ;;  %s3343_s15 = smov %s2602_s16 }
 0x1d8   : > { %s3344_s16 = smov %s3346_s19  ;;  %15 = sbr.rel (!%p13_p9) target bundleno = 4 (0x4), region = 72 }
 0x1df   :  { %2196 = vsyncpa [#allocation3], 1 }
 0x1e0   :  { %2198 = vsyncpa [#allocation3 + $0x1], 1 }

</bundles_post_ra>
